<compile_context>
chip_gen: v7x
topology: tpu7x:2x2x1
jax: 0.10.0
libtpu: 0.0.40
codegen_flags: <defaults>
</compile_context>

<pallas_src>
import functools

import jax
import jax.numpy as jnp
from jax import lax
from jax.experimental import pallas as pl
from jax.experimental.pallas import tpu as pltpu

_LANES = 128
_SUBLANES = 8
_UNIT = _LANES * _SUBLANES          # 1024 elements = one (8,128) sublane group
_MAX_BLOCK_BYTES = 4 << 20          # ~4 MiB per input block (native dtype)
_CHUNK_ROWS = 64                    # (64,128) f32 chunk = 8 vregs / intermediate


def _tile_partial_sum(pred_ref, targ_ref, *, loss_type, chunk_rows, rows_limit):
    """Sum |d| or d^2 over the first `rows_limit` rows (static) of the current
    tile, reduced to an (8,128) f32 vector of per-(sublane,lane) partial sums."""

    def chunk_val(start):
        p = pred_ref[pl.ds(start, chunk_rows), :].astype(jnp.float32)
        t = targ_ref[pl.ds(start, chunk_rows), :].astype(jnp.float32)
        d = p - t
        return jnp.abs(d) if loss_type == "l1" else d * d

    def fold(acc, v):
        return acc + jnp.sum(
            v.reshape(chunk_rows // _SUBLANES, _SUBLANES, _LANES), axis=0)

    acc = jnp.zeros((_SUBLANES, _LANES), jnp.float32)
    n_full = rows_limit // chunk_rows

    if n_full > 0:
        def body(c, a):
            start = pl.multiple_of(c * chunk_rows, chunk_rows)
            return fold(a, chunk_val(start))
        acc = lax.fori_loop(0, n_full, body, acc)

    rem = rows_limit - n_full * chunk_rows
    if rem:
        # One partial chunk: only here do we pay the iota + compare + select.
        start = n_full * chunk_rows            # static, still inside the block
        v = chunk_val(start)
        rid = lax.broadcasted_iota(jnp.int32, (chunk_rows, _LANES), 0)
        v = jnp.where(rid < rem, v, 0.0)       # rows past the array are garbage
        acc = fold(acc, v)
    return acc


def _loss_kernel(pred_ref, targ_ref, out_ref, *, loss_type, tile_rows, chunk_rows,
                 n_inner, n_tiles, last_tile_rows, has_phantom):
    i = pl.program_id(0)
    j = pl.program_id(1)
    tile_idx = i * n_inner + j

    @pl.when(j == 0)
    def _():
        out_ref[...] = jnp.zeros_like(out_ref)

    def add(rows_limit):
        out_ref[...] += _tile_partial_sum(
            pred_ref, targ_ref, loss_type=loss_type,
            chunk_rows=chunk_rows, rows_limit=rows_limit)

    last = n_tiles - 1
    if last_tile_rows == tile_rows:
        # No ragged last tile. Phantom tiles (odd tile count split over 2
        # cores) are skipped; everything else takes the unmasked fast path.
        if has_phantom:
            @pl.when(tile_idx < n_tiles)
            def _():
                add(tile_rows)
        else:
            add(tile_rows)
    else:
        @pl.when(tile_idx < last)          # fast path: no mask
        def _():
            add(tile_rows)

        @pl.when(tile_idx == last)         # masked path only on the last tile
        def _():
            add(last_tile_rows)
        # tile_idx > last (phantom) falls through: no accumulation.


def repr_reconstruct_loss(pred, target, loss_type: str = "l1", *,
                          max_block_bytes: int = _MAX_BLOCK_BYTES):
    """Mean L1 / L2 (MSE) loss between `pred` and `target` (Pallas TPU)."""
    loss_type = loss_type.lower()
    if loss_type not in ("l1", "l2"):
        raise NotImplementedError(f"Unsupported loss type: {loss_type}")
    assert pred.shape == target.shape

    n_elems = pred.size
    if n_elems == 0:
        return jnp.float32(jnp.nan)        # matches torch mean-reduction on empty

    p_flat = pred.reshape(-1)
    t_flat = target.reshape(-1)

    kernel_elems = (n_elems // _UNIT) * _UNIT
    tail_elems = n_elems - kernel_elems

    def _elem_loss(a, b):
        d = a.astype(jnp.float32) - b.astype(jnp.float32)
        return jnp.abs(d) if loss_type == "l1" else d * d

    # <1024-element tail handled outside the kernel (no full-array pad copy).
    if tail_elems:
        tail_sum = jnp.sum(_elem_loss(p_flat[kernel_elems:], t_flat[kernel_elems:]))
    else:
        tail_sum = jnp.float32(0.0)

    if kernel_elems == 0:
        # Tiny input (< 1024 elements): nothing worth launching a kernel for.
        return (tail_sum / n_elems).astype(jnp.float32)

    kernel_rows = kernel_elems // _LANES   # multiple of 8 by construction
    # Free (bitcast-level) reshape when the size is 1024-aligned (common case);
    # for awkward sizes the prefix slice is materialized by XLA (unavoidable
    # without a manual-DMA path). TODO(synk): manual-DMA gather of the exact
    # prefix would avoid that copy for unaligned sizes.
    p2 = p_flat[:kernel_elems].reshape(kernel_rows, _LANES)
    t2 = t_flat[:kernel_elems].reshape(kernel_rows, _LANES)

    itemsize = max(jnp.dtype(pred.dtype).itemsize, jnp.dtype(target.dtype).itemsize)
    cap_rows = max(_SUBLANES,
                   (max_block_bytes // (_LANES * itemsize)) // _SUBLANES * _SUBLANES)
    tile_rows = min(kernel_rows, cap_rows)             # multiple of 8
    n_tiles = pl.cdiv(kernel_rows, tile_rows)
    last_tile_rows = kernel_rows - (n_tiles - 1) * tile_rows

    # Always give both v7x TensorCores work when there is more than one tile.
    n_outer = 2 if n_tiles >= 2 else 1
    n_inner = pl.cdiv(n_tiles, n_outer)
    has_phantom = (n_outer * n_inner != n_tiles)

    chunk_rows = _CHUNK_ROWS if tile_rows % _CHUNK_ROWS == 0 else _SUBLANES
    last_block = n_tiles - 1

    def in_index_map(i, j):
        idx = i * n_inner + j
        if has_phantom:
            idx = jnp.minimum(idx, last_block)   # phantom tile re-reads a valid block
        return (idx, 0)

    kernel = functools.partial(
        _loss_kernel,
        loss_type=loss_type,
        tile_rows=tile_rows,
        chunk_rows=chunk_rows,
        n_inner=n_inner,
        n_tiles=n_tiles,
        last_tile_rows=last_tile_rows,
        has_phantom=has_phantom,
    )

    bytes_accessed = kernel_elems * (jnp.dtype(pred.dtype).itemsize
                                     + jnp.dtype(target.dtype).itemsize)
    cost = pl.CostEstimate(flops=3 * kernel_elems, transcendentals=0,
                           bytes_accessed=bytes_accessed)

    partial_sums = pl.pallas_call(
        kernel,
        out_shape=jax.ShapeDtypeStruct((n_outer * _SUBLANES, _LANES), jnp.float32),
        grid_spec=pltpu.PrefetchScalarGridSpec(
            num_scalar_prefetch=0,
            grid=(n_outer, n_inner),
            in_specs=[
                pl.BlockSpec((tile_rows, _LANES), in_index_map),
                pl.BlockSpec((tile_rows, _LANES), in_index_map),
            ],
            out_specs=pl.BlockSpec((_SUBLANES, _LANES), lambda i, j: (i, 0)),
        ),
        compiler_params=pltpu.CompilerParams(
            dimension_semantics=("parallel", "arbitrary"),
            vmem_limit_bytes=32 * 1024 * 1024,
        ),
        cost_estimate=cost,
    )(p2, t2)

    total = jnp.sum(partial_sums) + tail_sum
    return (total / n_elems).astype(jnp.float32)


if __name__ == "__main__":
    key = jax.random.PRNGKey(0)
    keys = jax.random.split(key, 8)

    def ref_loss(p, t, lt):
        d = p.astype(jnp.float32) - t.astype(jnp.float32)
        return jnp.mean(jnp.abs(d)) if lt == "l1" else jnp.mean(d * d)

    # 1) Small representation tensors (B, C, H, W), single-tile path.
    pred = jax.random.normal(keys[0], (2, 4, 16, 16), dtype=jnp.float32)
    targ = jax.random.normal(keys[1], (2, 4, 16, 16), dtype=jnp.float32)
    for lt in ("l1", "l2"):
        out = jax.block_until_ready(repr_reconstruct_loss(pred, targ, lt))
        r = ref_loss(pred, targ, lt)
        assert jnp.allclose(out, r, rtol=1e-5, atol=1e-6), (lt, out, r)

    # 2) Larger case forced onto a multi-tile grid via a small block-byte cap:
    #    exercises the always-on 2-way outer split with an ODD tile count
    #    (phantom tile), the masked last tile, and inner-axis accumulation.
    pred2 = jax.random.normal(keys[2], (2, 8, 128, 130), dtype=jnp.float32)
    targ2 = jax.random.normal(keys[3], (2, 8, 128, 130), dtype=jnp.float32)
    for lt in ("l1", "l2"):
        out = jax.block_until_ready(
            repr_reconstruct_loss(pred2, targ2, lt, max_block_bytes=128 * 1024))
        r = ref_loss(pred2, targ2, lt)
        assert jnp.allclose(out, r, rtol=1e-4, atol=1e-6), (lt, out, r)

    # 3) Awkward size: <1024-element tail folded in outside the kernel.
    pred3 = jax.random.normal(keys[4], (3, 5, 7, 11), dtype=jnp.float32)
    targ3 = jax.random.normal(keys[5], (3, 5, 7, 11), dtype=jnp.float32)
    for lt in ("l1", "l2"):
        out = jax.block_until_ready(repr_reconstruct_loss(pred3, targ3, lt))
        r = ref_loss(pred3, targ3, lt)
        assert jnp.allclose(out, r, rtol=1e-5, atol=1e-6), (lt, out, r)

    # 4) bf16 inputs: native-dtype DMA, f32 cast inside the kernel.
    pred4 = jax.random.normal(keys[6], (2, 4, 32, 32), dtype=jnp.bfloat16)
    targ4 = jax.random.normal(keys[7], (2, 4, 32, 32), dtype=jnp.bfloat16)
    for lt in ("l1", "l2"):
        out = jax.block_until_ready(repr_reconstruct_loss(pred4, targ4, lt))
        r = ref_loss(pred4, targ4, lt)
        assert jnp.allclose(out, r, rtol=1e-3, atol=1e-4), (lt, out, r)

    print("KERNEL_OK")
</pallas_src>

<mosaic_0001>
module attributes {stable_mosaic.version = 11 : i64} {
  func.func @_loss_kernel(%arg0: i32, %arg1: i32, %arg2: memref<16x128xf32, #tpu.memory_space<vmem>>, %arg3: memref<16x128xf32, #tpu.memory_space<vmem>>, %arg4: memref<8x128xf32, #tpu.memory_space<vmem>>) attributes {dimension_semantics = [#tpu.dimension_semantics<parallel>, #tpu.dimension_semantics<arbitrary>], iteration_bounds = array<i64: 1, 1>, scalar_prefetch = 0 : i64, scratch_operands = 0 : i64, tpu.core_type = #tpu.core_type<tc>, window_params = [{transform_indices = @transform_0, window_bounds = array<i64: 16, 128>}, {transform_indices = @transform_1, window_bounds = array<i64: 16, 128>}, {transform_indices = @transform_2, window_bounds = array<i64: 8, 128>}]} {
    %c0_i32 = arith.constant 0 : i32
    %0 = arith.cmpi eq, %arg1, %c0_i32 : i32
    %1 = arith.extui %0 : i1 to i32
    %c0_i32_0 = arith.constant 0 : i32
    %2 = arith.cmpi ne, %1, %c0_i32_0 : i32
    scf.if %2 {
      %cst_6 = arith.constant 0.000000e+00 : f32
      %9 = vector.broadcast %cst_6 : f32 to vector<8x128xf32>
      %c0_7 = arith.constant 0 : index
      %c0_8 = arith.constant 0 : index
      %10 = vector.load %arg4[%c0_7, %c0_8] : memref<8x128xf32, #tpu.memory_space<vmem>>, vector<8x128xf32>
      tpu.vector_store %arg4[%c0_7, %c0_8], %9 {strides = array<i32>} : memref<8x128xf32, #tpu.memory_space<vmem>>, vector<8x128xf32>,
    } else {
    }
    %c0 = arith.constant 0 : index
    %c0_1 = arith.constant 0 : index
    %3 = vector.load %arg4[%c0, %c0_1] : memref<8x128xf32, #tpu.memory_space<vmem>>, vector<8x128xf32>
    %cst = arith.constant 0.000000e+00 : f32
    %4 = vector.broadcast %cst : f32 to vector<8x128xf32>
    %c0_i32_2 = arith.constant 0 : i32
    %c2_i32 = arith.constant 2 : i32
    %5 = arith.addi %c0_i32_2, %c2_i32 : i32
    %c1_i32 = arith.constant 1 : i32
    %6 = scf.for %arg5 = %c0_i32_2 to %5 step %c1_i32 iter_args(%arg6 = %4) -> (vector<8x128xf32>)  : i32 {
      %c8_i32 = arith.constant 8 : i32
      %9 = arith.muli %arg5, %c8_i32 : i32
      %10 = tpu.assume_multiple %9, 8 : i32
      %11 = arith.index_cast %10 : i32 to index
      %c0_6 = arith.constant 0 : index
      %12 = vector.load %arg2[%11, %c0_6] : memref<16x128xf32, #tpu.memory_space<vmem>>, vector<8x128xf32>
      %13 = arith.index_cast %10 : i32 to index
      %c0_7 = arith.constant 0 : index
      %14 = vector.load %arg3[%13, %c0_7] : memref<16x128xf32, #tpu.memory_space<vmem>>, vector<8x128xf32>
      %15 = arith.subf %12, %14 : vector<8x128xf32>
      %16 = math.absf %15 : vector<8x128xf32>
      %17 = vector.shape_cast %16 : vector<8x128xf32> to vector<1x8x128xf32>
      %cst_8 = arith.constant dense<0.000000e+00> : vector<8x128xf32>
      %18 = vector.multi_reduction <add>, %17, %cst_8 [0] : vector<1x8x128xf32> to vector<8x128xf32>
      %19 = arith.addf %arg6, %18 : vector<8x128xf32>
      scf.yield %19 : vector<8x128xf32>
    }
    %c2_i32_3 = arith.constant 2 : i32
    %7 = arith.addf %3, %6 : vector<8x128xf32>
    %c0_4 = arith.constant 0 : index
    %c0_5 = arith.constant 0 : index
    %8 = vector.load %arg4[%c0_4, %c0_5] : memref<8x128xf32, #tpu.memory_space<vmem>>, vector<8x128xf32>
    tpu.vector_store %arg4[%c0_4, %c0_5], %7 {strides = array<i32>} : memref<8x128xf32, #tpu.memory_space<vmem>>, vector<8x128xf32>,
    return
  }
  func.func @transform_0(%arg0: i32, %arg1: i32) -> (i32, i32) {
    %c1_i32 = arith.constant 1 : i32
    %0 = arith.muli %arg0, %c1_i32 : i32
    %1 = arith.addi %0, %arg1 : i32
    %c0_i32 = arith.constant 0 : i32
    %c0_i32_0 = arith.constant 0 : i32
    return %1, %c0_i32 : i32, i32
  }
  func.func @transform_1(%arg0: i32, %arg1: i32) -> (i32, i32) {
    %c1_i32 = arith.constant 1 : i32
    %0 = arith.muli %arg0, %c1_i32 : i32
    %1 = arith.addi %0, %arg1 : i32
    %c0_i32 = arith.constant 0 : i32
    %c0_i32_0 = arith.constant 0 : i32
    return %1, %c0_i32 : i32, i32
  }
  func.func @transform_2(%arg0: i32, %arg1: i32) -> (i32, i32) {
    %c0_i32 = arith.constant 0 : i32
    %c0_i32_0 = arith.constant 0 : i32
    return %arg0, %c0_i32 : i32, i32
  }
}

</mosaic_0001>

<bundles_post_ra>
// kernel: tpu_custom_call.1
= control target key start
LH: loop header
LB: loop body
LE: loop exit
PB: predicated region body
PF: predicated region fallthrough
CT: control target
= control target key end

     0   :  { %7 = vsyncpa [#allocation3], 0  ;;  %s272_s0 = inlined_call_operand.hbm [shape: f32[16,128], index: 0, kind: input, shape index: {}]   ;;  %s273_s1 = inlined_call_operand.hbm [shape: f32[16,128], index: 1, kind: input, shape index: {}]   ;;  %s274_s2 = inlined_call_operand.hbm [shape: f32[8,128], index: 2, kind: output, shape index: {}]  }
   0x1   :  { %8 = vsyncpa [#allocation6], 0 }
   0x2   :  { %9 = vsyncpa [#allocation4], 0  ;;  %s215_s9 = smov [#allocation2]   ;;  %s127_s13 = scalar_lea.hbm %s272_s0, 256 }
   0x3   :  { %s19_s10 = sshll.u32 %s215_s9, 4  ;;  %p128_p0 = scmp.ne.s32.totalorder %s272_s0, %s127_s13  ;;  %s20_s10 = int_to_ptr.vmem [resolvable:$true] %s19_s10 }
   0x4   :  { %p131_p1 = scmp.lt.u32.totalorder %s127_s13, %s272_s0 }
   0x6   :  { %p133_p2 = pnand %p131_p1, %p128_p0 }
   0x8   :  { %136 = shalt.err (!%p133_p2)
}
   0x9   :  { %s137_s18 = scalar_lea.vmem %s20_s10, 256  ;;  %p142_p4 = scmp.lt.s32.totalorder %s20_s10, %s20_s10 }
   0xa   :  { %p138_p3 = scmp.ne.s32.totalorder %s20_s10, %s137_s18  ;;  %p143_p5 = scmp.lt.s32.totalorder %s137_s18, %s137_s18 }
   0xc   :  { %p144_p6 = por %p143_p5, %p142_p4 }
   0xe   :  { %p145_p7 = pnand %p144_p6, %p138_p3 }
  0x10   :  { %148 = shalt.err (!%p145_p7)
}
  0x11   :  { %s216_s19 = smov 128   ;;  %s217_s20 = smov 8  }
  0x12   :  { %25 = dma.hbm_to_vmem [thread:$0]  %s272_s0, 256, %s20_s10, [#allocation3], %s216_s19, %s216_s19, %s217_s20  }
  0x13   :  { %s218_s23 = smov [#allocation5]   ;;  %s149_s27 = scalar_lea.hbm %s273_s1, 256 }
  0x14   :  { %s35_s24 = sshll.u32 %s218_s23, 4  ;;  %p150_p8 = scmp.ne.s32.totalorder %s273_s1, %s149_s27  ;;  %s36_s24 = int_to_ptr.vmem [resolvable:$true] %s35_s24 }
  0x15   :  { %p153_p9 = scmp.lt.u32.totalorder %s149_s27, %s273_s1 }
  0x17   :  { %p155_p10 = pnand %p153_p9, %p150_p8 }
  0x19   :  { %158 = shalt.err (!%p155_p10)
}
  0x1a   :  { %s159_s4 = scalar_lea.vmem %s36_s24, 256  ;;  %p164_p12 = scmp.lt.s32.totalorder %s36_s24, %s36_s24 }
  0x1b   :  { %p160_p11 = scmp.ne.s32.totalorder %s36_s24, %s159_s4  ;;  %p165_p13 = scmp.lt.s32.totalorder %s159_s4, %s159_s4 }
  0x1d   :  { %p166_p0 = por %p165_p13, %p164_p12 }
  0x1f   :  { %p167_p1 = pnand %p166_p0, %p160_p11 }
  0x21   :  { %170 = shalt.err (!%p167_p1)
}
  0x22   :  { %41 = dma.hbm_to_vmem [thread:$0]  %s273_s1, 256, %s36_s24, [#allocation6], %s216_s19, %s216_s19, %s217_s20  }
  0x23   :  { %201 = dma.done.wait [#allocation3], 256  }
  0x24   :  { %202 = vsyncadd [#allocation3], 4294967040 }
  0x25   :  { %203 = dma.done.wait [#allocation6], 256  }
  0x26   :  { %204 = vsyncadd [#allocation6], 4294967040  ;;  %v219_v0 = vmov 0.0   ;;  %v207_v1 = vmov 0.0   ;;  %s211_s6 = smov 0  }
  0x27   :  { %56 = vst [vmem:[#allocation7] sm:$0xff] %v219_v0 }
  0x28 LB: > { %s104_s7 = sshll.u32 %s213_s6, 3  ;;  %s63_s6 = sadd.s32 1, %s213_s6   ;;  %s213_s6 = sphi %s211_s6, %s63_s6   ;;  %v209_v1 = vphi %v207_v1, %v208_v1  }
  0x29   : > { %s66_s8 = scalar_lea.vmem [#allocation2], %s104_s7  ;;  %s68_s9 = scalar_lea.vmem [#allocation5], %s104_s7 }
  0x2a   : > { %v67_v2 = vld [vmem:[%s66_s8] sm:$0xff]  ;;  %p60_p2 = scmp.ge.s32.totalorder %s63_s6, 2  }
  0x2b   : > { %v69_v3 = vld [vmem:[%s68_s9] sm:$0xff]  ;;  %s220_s1 = smov (%p60_p2), [#allocation7]  }
  0x2c   : > { %v70_v4 = vsub.f32 %v67_v2, %v69_v3  ;;  %62 = sbr.rel (!%p60_p2) target bundleno = 40 (0x28), region = 51  ;;  %s82_s10 = sshll.u32 (%p60_p2), %s220_s1, 4  ;;  %s83_s10 = int_to_ptr.vmem [resolvable:$true] %s82_s10 }
  0x2d   :  { %s171_s11 = scalar_lea.vmem (%p60_p2), %s83_s10, 128  ;;  %p176_p4 = scmp.lt.s32.totalorder (%p60_p2), %s83_s10, %s83_s10 }
  0x2e   : > { %v71_v5 = vand.u32 2147483647, %v70_v4  ;;  %p172_p3 = scmp.ne.s32.totalorder (%p60_p2), %s83_s10, %s171_s11  ;;  %p177_p5 = scmp.lt.s32.totalorder (%p60_p2), %s171_s11, %s171_s11 }
  0x30   : > { %v73_v6 = vadd.f32 %v209_v1, %v71_v5   ;;  %p178_p6 = por (%p60_p2), %p177_p5, %p176_p4 }
  0x32   : > { %v208_v1 = vmov %v73_v6   ;;  %75 = vst [vmem:[#allocation7] sm:$0xff] (%p60_p2), %v73_v6  ;;  %p179_p7 = pnand (%p60_p2), %p178_p6, %p172_p3 }
  0x34   :  { %182 = shalt.err (!%p179_p7)
}
  0x35   :  { %s183_s14 = scalar_lea.hbm %s274_s2, 128 }
  0x36   :  { %p184_p8 = scmp.ne.s32.totalorder %s274_s2, %s183_s14  ;;  %p187_p9 = scmp.lt.u32.totalorder %s183_s14, %s274_s2 }
  0x38   :  { %p189_p10 = pnand %p187_p9, %p184_p8 }
  0x3a   :  { %192 = shalt.err (!%p189_p10)
}
  0x3b   :  { %85 = dma.vmem_to_hbm [thread:$0]  %s83_s10, 128, %s274_s2, [#allocation4]  }
  0x3c   :  { %205 = dma.done.wait [#allocation4], 128  }
  0x3d   :  { %206 = vsyncadd [#allocation4], 4294967168 }
  0x3e   :  { %89 = vsyncpa [#allocation3], 1 }
  0x3f   :  { %90 = vsyncpa [#allocation6], 1 }
  0x40   :  { %91 = vsyncpa [#allocation4], 1 }

</bundles_post_ra>
